<compile_context>
chip_gen: v7x
topology: tpu7x:2x2x1
jax: 0.10.0
libtpu: 0.0.40
codegen_flags: <defaults>
</compile_context>

<pallas_src>
import functools

import jax
import jax.numpy as jnp
from jax.experimental import pallas as pl
from jax.experimental.pallas import tpu as pltpu


def _blended_ordering_loss_kernel(x_ref, o_ref, *, batch, block_b):
    """One batch tile: x_ref (block_b, N) -> o_ref (8, 128) broadcast partial sum."""
    x = x_ref[...].astype(jnp.float32)            # (block_b, N), f32 math in VMEM
    rows, n = x.shape

    ones_col = jnp.ones((rows, 1), jnp.float32)
    zeros_col = jnp.zeros((rows, 1), jnp.float32)
    # xp[j], xp[j+1], xp[j+2] for j = 0..N-1, each as a full-width (rows, N)
    # array: the '10' boundary columns are fused here instead of being built
    # (and round-tripped) in HBM by the wrapper. x itself plays xp[j+1].
    x_prev = jnp.concatenate([ones_col, x[:, : n - 1]], axis=1)   # xp[j]
    x_next = jnp.concatenate([x[:, 1:], zeros_col], axis=1)       # xp[j+2]

    d_p0 = jnp.square(x_prev - x)        # == d_p[:, :-1]
    d_p1 = jnp.square(x - x_next)        # == d_p[:, 1:]
    d_n = jnp.square(x_prev - x_next)    # == d_n

    t1 = 1.5 * d_p0 - 0.5 * d_n
    t2 = 1.5 * d_p1 - 0.5 * d_n
    contrib = jnp.maximum(t1, 0.0) + jnp.maximum(t2, 0.0)

    if batch % block_b != 0:
        # Tail tile: rows past the true batch are padding with undefined
        # contents; mask their contribution (select, so garbage/NaN in the
        # padded rows cannot propagate into the sum).
        row = (pl.program_id(0) * block_b
               + jax.lax.broadcasted_iota(jnp.int32, contrib.shape, 0))
        contrib = jnp.where(row < batch, contrib, 0.0)

    s = jnp.sum(contrib)
    # Lane-dense output block; the wrapper reads element [0, 0] of each tile.
    o_ref[...] = jnp.full((8, 128), s, dtype=jnp.float32)


def _pick_block_b(batch, n_feat, vmem_budget_bytes=8 * 1024 * 1024):
    """Rows per tile: keep ~10 f32 copies of the tile under the VMEM budget."""
    per_row_bytes = max(n_feat, 128) * 4 * 10
    bb = max(1, vmem_budget_bytes // per_row_bytes)
    bb = min(bb, 1024, max(batch, 8))
    return int(max(8, (bb // 8) * 8))


def _loss_reference_jax(x, append="10"):
    """Pure-JAX mirror of the PyTorch forward (fallback path + correctness check)."""
    x = x.astype(jnp.float32)
    b = x.shape[0]
    if append == "10":
        x = jnp.concatenate(
            [jnp.ones((b, 1), x.dtype), x, jnp.zeros((b, 1), x.dtype)], axis=-1)
    elif append == "0":
        x = jnp.concatenate([x, jnp.zeros((b, 1), x.dtype)], axis=-1)
    d_p = jnp.square(x[:, :-1] - x[:, 1:])
    d_n = jnp.square(x[:, :-2] - x[:, 2:])
    t1 = d_p[:, :-1] - d_n + 0.5 * d_p[:, :-1] + 0.5 * d_n
    t2 = d_p[:, 1:] - d_n + 0.5 * d_p[:, 1:] + 0.5 * d_n
    terms = jnp.maximum(jnp.concatenate([t1, t2], axis=0), 0.0)
    return jnp.mean(terms)


def blended_ordering_loss(x, append="10", *, block_b=None, use_pallas=None):
    """Forward pass of CustomBlendedOrderingLoss (loss_type='square_max')."""
    batch, n_feat = x.shape

    if append != "10":
        # TODO(synk): Pallas path is specialized for the module default append='10';
        # append='0'/'none' (and the 'abs' distance metric) use the fused XLA path.
        return _loss_reference_jax(x, append)

    if use_pallas is None:
        # For tiny inputs the fixed Pallas launch/step overhead dominates; let
        # XLA's fused elementwise+reduce handle them.
        use_pallas = batch * n_feat >= 65536
    if not use_pallas:
        return _loss_reference_jax(x, append)

    if block_b is None:
        block_b = _pick_block_b(batch, n_feat)
    num_tiles = (batch + block_b - 1) // block_b

    kernel = functools.partial(
        _blended_ordering_loss_kernel, batch=batch, block_b=block_b)

    partials = pl.pallas_call(
        kernel,
        out_shape=jax.ShapeDtypeStruct((num_tiles * 8, 128), jnp.float32),
        grid=(num_tiles,),
        in_specs=[pl.BlockSpec((block_b, n_feat), lambda i: (i, 0))],
        out_specs=pl.BlockSpec((8, 128), lambda i: (i, 0)),
        compiler_params=pltpu.CompilerParams(
            dimension_semantics=("parallel",)),
    )(x)

    total = jnp.sum(partials[::8, 0])
    # mean over the (2*B, N) loss-term tensor of the reference.
    return total / jnp.float32(2 * batch * n_feat)


if __name__ == "__main__":
    key = jax.random.PRNGKey(0)
    k1, k2, k3 = jax.random.split(key, 3)

    # 1) f32 input, aligned tiles (B=16, N=128): forced Pallas path.
    x1 = jax.random.normal(k1, (16, 128), dtype=jnp.float32)
    loss1 = blended_ordering_loss(x1, use_pallas=True)
    jax.block_until_ready(loss1)
    ref1 = _loss_reference_jax(x1)
    assert bool(jnp.isfinite(loss1)), "non-finite loss (f32 case)"
    assert float(jnp.abs(loss1 - ref1)) <= 1e-5 + 1e-4 * float(jnp.abs(ref1)), (
        f"f32 mismatch: kernel={loss1} ref={ref1}")

    # 2) bf16 input, ragged batch (B=20, block_b=8) exercising tail-row masking.
    x2 = jax.random.normal(k2, (20, 256), dtype=jnp.float32).astype(jnp.bfloat16)
    loss2 = blended_ordering_loss(x2, use_pallas=True, block_b=8)
    jax.block_until_ready(loss2)
    ref2 = _loss_reference_jax(x2)
    assert bool(jnp.isfinite(loss2)), "non-finite loss (bf16 case)"
    assert float(jnp.abs(loss2 - ref2)) <= 1e-4 + 1e-3 * float(jnp.abs(ref2)), (
        f"bf16 mismatch: kernel={loss2} ref={ref2}")

    # 3) tiny input -> auto-dispatches to the pure-JAX fast path.
    x3 = jax.random.normal(k3, (2, 16), dtype=jnp.float32)
    loss3 = blended_ordering_loss(x3)
    jax.block_until_ready(loss3)
    ref3 = _loss_reference_jax(x3)
    assert float(jnp.abs(loss3 - ref3)) <= 1e-6, (
        f"fast-path mismatch: kernel={loss3} ref={ref3}")

    print("KERNEL_OK")
</pallas_src>

<mosaic_0001>
module attributes {stable_mosaic.version = 11 : i64} {
  func.func @_blended_ordering_loss_kernel(%arg0: i32, %arg1: memref<16x128xf32, #tpu.memory_space<vmem>>, %arg2: memref<8x128xf32, #tpu.memory_space<vmem>>) attributes {dimension_semantics = [#tpu.dimension_semantics<parallel>], iteration_bounds = array<i64: 1>, scalar_prefetch = 0 : i64, scratch_operands = 0 : i64, tpu.core_type = #tpu.core_type<tc>, window_params = [{transform_indices = @transform_0, window_bounds = array<i64: 16, 128>}, {transform_indices = @transform_1, window_bounds = array<i64: 8, 128>}]} {
    %c0 = arith.constant 0 : index
    %c0_0 = arith.constant 0 : index
    %0 = vector.load %arg1[%c0, %c0_0] : memref<16x128xf32, #tpu.memory_space<vmem>>, vector<16x128xf32>
    %cst = arith.constant 1.000000e+00 : f32
    %1 = vector.broadcast %cst : f32 to vector<16x1xf32>
    %cst_1 = arith.constant 0.000000e+00 : f32
    %2 = vector.broadcast %cst_1 : f32 to vector<16x1xf32>
    %3 = vector.extract_strided_slice %0 {offsets = [0, 0], sizes = [16, 127], strides = [1, 1]} : vector<16x128xf32> to vector<16x127xf32>
    %4 = tpu.concatenate %1, %3 in 1 : vector<16x1xf32>, vector<16x127xf32> -> vector<16x128xf32>
    %5 = vector.extract_strided_slice %0 {offsets = [0, 1], sizes = [16, 127], strides = [1, 1]} : vector<16x128xf32> to vector<16x127xf32>
    %6 = tpu.concatenate %5, %2 in 1 : vector<16x127xf32>, vector<16x1xf32> -> vector<16x128xf32>
    %7 = arith.subf %4, %0 : vector<16x128xf32>
    %8 = arith.mulf %7, %7 : vector<16x128xf32>
    %9 = arith.subf %0, %6 : vector<16x128xf32>
    %10 = arith.mulf %9, %9 : vector<16x128xf32>
    %11 = arith.subf %4, %6 : vector<16x128xf32>
    %12 = arith.mulf %11, %11 : vector<16x128xf32>
    %cst_2 = arith.constant 1.500000e+00 : f32
    %13 = vector.broadcast %cst_2 : f32 to vector<16x128xf32>
    %14 = arith.mulf %13, %8 : vector<16x128xf32>
    %cst_3 = arith.constant 5.000000e-01 : f32
    %15 = vector.broadcast %cst_3 : f32 to vector<16x128xf32>
    %16 = arith.mulf %15, %12 : vector<16x128xf32>
    %17 = arith.subf %14, %16 : vector<16x128xf32>
    %cst_4 = arith.constant 1.500000e+00 : f32
    %18 = vector.broadcast %cst_4 : f32 to vector<16x128xf32>
    %19 = arith.mulf %18, %10 : vector<16x128xf32>
    %cst_5 = arith.constant 5.000000e-01 : f32
    %20 = vector.broadcast %cst_5 : f32 to vector<16x128xf32>
    %21 = arith.mulf %20, %12 : vector<16x128xf32>
    %22 = arith.subf %19, %21 : vector<16x128xf32>
    %cst_6 = arith.constant 0.000000e+00 : f32
    %23 = vector.broadcast %cst_6 : f32 to vector<16x128xf32>
    %24 = arith.maximumf %17, %23 : vector<16x128xf32>
    %cst_7 = arith.constant 0.000000e+00 : f32
    %25 = vector.broadcast %cst_7 : f32 to vector<16x128xf32>
    %26 = arith.maximumf %22, %25 : vector<16x128xf32>
    %27 = arith.addf %24, %26 : vector<16x128xf32>
    %28 = vector.shape_cast %27 : vector<16x128xf32> to vector<1x16x128xf32>
    %cst_8 = arith.constant dense<0.000000e+00> : vector<1xf32>
    %29 = vector.multi_reduction <add>, %28, %cst_8 [1, 2] : vector<1x16x128xf32> to vector<1xf32>
    %30 = vector.shape_cast %29 : vector<1xf32> to vector<1x1x1xf32>
    %31 = vector.extract %30[0, 0, 0] : f32 from vector<1x1x1xf32>
    %32 = vector.broadcast %31 : f32 to vector<8x128xf32>
    %c0_9 = arith.constant 0 : index
    %c0_10 = arith.constant 0 : index
    %33 = vector.load %arg2[%c0_9, %c0_10] : memref<8x128xf32, #tpu.memory_space<vmem>>, vector<8x128xf32>
    tpu.vector_store %arg2[%c0_9, %c0_10], %32 {strides = array<i32>} : memref<8x128xf32, #tpu.memory_space<vmem>>, vector<8x128xf32>,
    return
  }
  func.func @transform_0(%arg0: i32) -> (i32, i32) {
    %c0_i32 = arith.constant 0 : i32
    %c0_i32_0 = arith.constant 0 : i32
    return %arg0, %c0_i32 : i32, i32
  }
  func.func @transform_1(%arg0: i32) -> (i32, i32) {
    %c0_i32 = arith.constant 0 : i32
    %c0_i32_0 = arith.constant 0 : i32
    return %arg0, %c0_i32 : i32, i32
  }
}

</mosaic_0001>

<bundles_post_ra>
// kernel: tpu_custom_call.1
= control target key start
LH: loop header
LB: loop body
LE: loop exit
PB: predicated region body
PF: predicated region fallthrough
CT: control target
= control target key end

     0   :  { %6 = vsyncpa [#allocation3], 0  ;;  %s196_s0 = inlined_call_operand.hbm [shape: f32[16,128], index: 0, kind: input, shape index: {}]   ;;  %s197_s1 = inlined_call_operand.hbm [shape: f32[8,128], index: 1, kind: output, shape index: {}]  }
   0x1   :  { %7 = vsyncpa [#allocation4], 0  ;;  %s156_s6 = smov [#allocation2]   ;;  %s108_s10 = scalar_lea.hbm %s196_s0, 256 }
   0x2   :  { %s13_s7 = sshll.u32 %s156_s6, 4  ;;  %p109_p0 = scmp.ne.s32.totalorder %s196_s0, %s108_s10  ;;  %s14_s7 = int_to_ptr.vmem [resolvable:$true] %s13_s7 }
   0x3   :  { %p112_p1 = scmp.lt.u32.totalorder %s108_s10, %s196_s0 }
   0x5   :  { %p114_p2 = pnand %p112_p1, %p109_p0 }
   0x7   :  { %117 = shalt.err (!%p114_p2)
}
   0x8   :  { %s118_s15 = scalar_lea.vmem %s14_s7, 256  ;;  %p123_p4 = scmp.lt.s32.totalorder %s14_s7, %s14_s7 }
   0x9   :  { %p119_p3 = scmp.ne.s32.totalorder %s14_s7, %s118_s15  ;;  %p124_p5 = scmp.lt.s32.totalorder %s118_s15, %s118_s15 }
   0xb   :  { %p125_p6 = por %p124_p5, %p123_p4 }
   0xd   :  { %p126_p7 = pnand %p125_p6, %p119_p3 }
   0xf   :  { %129 = shalt.err (!%p126_p7)
}
  0x10   :  { %s157_s16 = smov 128   ;;  %s158_s17 = smov 8  }
  0x11   :  { %19 = dma.hbm_to_vmem [thread:$0]  %s196_s0, 256, %s14_s7, [#allocation3], %s157_s16, %s157_s16, %s158_s17  }
  0x12   :  { %152 = dma.done.wait [#allocation3], 256  }
  0x13   :  { %153 = vsyncadd [#allocation3], 4294967040  ;;  %v23_v0 = vld [vmem:[#allocation2] sm:$0xff]  ;;  %s159_s20 = smov 127   ;;  %s160_s21 = smov 1   ;;  %v24_v1 = vld [vmem:[#allocation2 + $0x8] sm:$0xff] }
  0x14   :  { %36 = vrot.lane.b32.xlu1 %v23_v0, %s159_s20  ;;  %27 = vrot.lane.b32.xlu0 %v23_v0, %s160_s21  ;;  %vm42_vm0 = vcmask 1039360   ;;  %vm33_vm1 = vcmask 7168   ;;  %s161_s0 = smov [#allocation5]  }
  0x15   :  { %s91_s22 = sshll.u32 %s161_s0, 4  ;;  %s92_s22 = int_to_ptr.vmem [resolvable:$true] %s91_s22 }
  0x16   :  { %s130_s24 = scalar_lea.vmem %s92_s22, 128  ;;  %p135_p9 = scmp.lt.s32.totalorder %s92_s22, %s92_s22 }
  0x17   :  { %p131_p8 = scmp.ne.s32.totalorder %s92_s22, %s130_s24  ;;  %p136_p10 = scmp.lt.s32.totalorder %s130_s24, %s130_s24 }
  0x18   :  { %38 = vrot.lane.b32.xlu1 %v24_v1, %s159_s20  ;;  %29 = vrot.lane.b32.xlu0 %v24_v1, %s160_s21 }
  0x19   :  { %p137_p11 = por %p136_p10, %p135_p9 }
  0x1b   :  { %p138_p12 = pnand %p137_p11, %p131_p8 }
  0x86   :  { %v37_v2 = vpop.permute.xlu1 %36  ;;  %v28_v3 = vpop.permute.xlu0 %27 }
  0x87   :  { %v43_v4 = vsel %vm42_vm0, %v37_v2, 0.0  ;;  %v34_v5 = vsel %vm33_vm1, 1.0, %v28_v3 }
  0x88   :  { %v49_v6 = vsub.f32 %v23_v0, %v43_v4  ;;  %v45_v7 = vsub.f32 %v34_v5, %v23_v0  ;;  %v53_v8 = vsub.f32 %v34_v5, %v43_v4 }
  0x8a   :  { %v51_v9 = vmul.f32 %v49_v6, %v49_v6  ;;  %v47_v10 = vmul.f32 %v45_v7, %v45_v7  ;;  %v55_v11 = vmul.f32 %v53_v8, %v53_v8  ;;  %v39_v12 = vpop.permute.xlu1 %38  ;;  %v30_v13 = vpop.permute.xlu0 %29 }
  0x8b   :  { %v44_v14 = vsel %vm42_vm0, %v39_v12, 0.0  ;;  %v35_v15 = vsel %vm33_vm1, 1.0, %v30_v13 }
  0x8c   :  { %v63_v16 = vmul.f32 1.5, %v51_v9  ;;  %v57_v17 = vmul.f32 1.5, %v47_v10  ;;  %v59_v18 = vmul.f32 0.5, %v55_v11  ;;  %v50_v19 = vsub.f32 %v24_v1, %v44_v14 }
  0x8d   :  { %v46_v20 = vsub.f32 %v35_v15, %v24_v1  ;;  %v54_v21 = vsub.f32 %v35_v15, %v44_v14 }
  0x8e   :  { %v52_v22 = vmul.f32 %v50_v19, %v50_v19  ;;  %v61_v23 = vsub.f32 %v57_v17, %v59_v18  ;;  %v65_v24 = vsub.f32 %v63_v16, %v59_v18 }
  0x8f   :  { %v48_v25 = vmul.f32 %v46_v20, %v46_v20  ;;  %v56_v26 = vmul.f32 %v54_v21, %v54_v21 }
  0x90   :  { %v64_v27 = vmul.f32 1.5, %v52_v22  ;;  %v67_v30 = vmax.f32 %v61_v23, 0.0  ;;  %v69_v31 = vmax.f32 %v65_v24, 0.0 }
  0x91   :  { %v58_v28 = vmul.f32 1.5, %v48_v25  ;;  %v60_v29 = vmul.f32 0.5, %v56_v26 }
  0x92   :  { %v71_v36 = vadd.f32 %v69_v31, %v67_v30 }
  0x93   :  { %v62_v32 = vsub.f32 %v58_v28, %v60_v29  ;;  %v66_v33 = vsub.f32 %v64_v27, %v60_v29 }
  0x95   :  { %v68_v34 = vmax.f32 %v62_v32, 0.0  ;;  %v70_v35 = vmax.f32 %v66_v33, 0.0 }
  0x97   :  { %v72_v37 = vadd.f32 %v70_v35, %v68_v34 }
  0x99   :  { %v73_v38 = vadd.f32 %v72_v37, %v71_v36 }
  0x9b   :  { %74 = vadd.xlane.f32.xlu0 %v73_v38 }
 0x128   :  { %v75_v39 = vpop.xlane.xlu0 %74 }
 0x129   :  { %v76_v40 = vrot.slane %v75_v39, 4 }
 0x12b   :  { %v77_v41 = vadd.f32 %v76_v40, %v75_v39 }
 0x12d   :  { %v78_v42 = vrot.slane %v77_v41, 2 }
 0x12f   :  { %v79_v43 = vadd.f32 %v78_v42, %v77_v41 }
 0x131   :  { %v80_v44 = vrot.slane %v79_v43, 1 }
 0x133   :  { %v81_v45 = vadd.f32 %v80_v44, %v79_v43 }
 0x135   :  { %100 = vpush %v81_v45 }
 0x166   :  { %s101_s23 = spop %100 }
 0x167   :  { %v83_v46 = vstv %s101_s23 }
 0x168   :  { %84 = vst [vmem:[#allocation5] sm:$0xff] %v83_v46 }
 0x169   :  { %141 = shalt.err (!%p138_p12)
}
 0x16a   :  { %s142_s27 = scalar_lea.hbm %s197_s1, 128 }
 0x16b   :  { %p143_p13 = scmp.ne.s32.totalorder %s197_s1, %s142_s27  ;;  %p146_p0 = scmp.lt.u32.totalorder %s142_s27, %s197_s1 }
 0x16d   :  { %p148_p1 = pnand %p146_p0, %p143_p13 }
 0x16f   :  { %151 = shalt.err (!%p148_p1)
}
 0x170   :  { %94 = dma.vmem_to_hbm [thread:$0]  %s92_s22, 128, %s197_s1, [#allocation4]  }
 0x171   :  { %154 = dma.done.wait [#allocation4], 128  }
 0x172   :  { %155 = vsyncadd [#allocation4], 4294967168 }
 0x173   :  { %98 = vsyncpa [#allocation3], 1 }
 0x174   :  { %99 = vsyncpa [#allocation4], 1 }

</bundles_post_ra>
